<compile_context>
chip_gen: v5e
topology: v5e:2x2
jax: 0.10.0
libtpu: 0.0.40
codegen_flags: <defaults>
</compile_context>

<pallas_src>
import numpy as np
import jax
import jax.numpy as jnp
from jax import lax
from jax.experimental import pallas as pl
from jax.experimental.pallas import tpu as pltpu

EPS = 1e-5  # nn.BatchNorm1d default


def siamese_kernel(fp1_ref, fp2_ref,
                   w1_ref, w2_ref, w3_ref, w4_ref,
                   vh1_ref, vh2_ref, vtail_ref,
                   out_ref):
    B = fp1_ref.shape[0]
    A = w3_ref.shape[1]

    # Packed per-feature vectors; static slices are zero-cost views.
    b1, g1, be1 = vh1_ref[0:1, :], vh1_ref[1:2, :], vh1_ref[2:3, :]   # [1, H1]
    b2, g2, be2 = vh2_ref[0:1, :], vh2_ref[1:2, :], vh2_ref[2:3, :]   # [1, H2]
    b3 = vtail_ref[0:1, :]         # [1, A]
    b4 = vtail_ref[1:2, 0:1]       # [1, 1]

    # Stack the two branches -> one MXU matmul per layer.
    x = jnp.concatenate([fp1_ref[...], fp2_ref[...]], axis=0)          # [2B, E]

    def relu_bn(h, gamma, beta):
        # ReLU, then training-mode BatchNorm1d with PER-BRANCH batch stats,
        # folded to a single scale/shift per branch.
        h = jnp.maximum(h, 0.0)

        def half(xh):                                                  # [B, F]
            m = jnp.mean(xh, axis=0, keepdims=True)                    # [1, F]
            v = jnp.mean(xh * xh, axis=0, keepdims=True) - m * m       # E[x^2]-m^2
            v = jnp.maximum(v, 0.0)                                    # guard cancellation
            s = gamma * lax.rsqrt(v + EPS)                             # [1, F] (EUP)
            t = beta - m * s                                           # [1, F]
            return xh * s + t                                          # 2 VPU ops

        # B rows == one f32 sublane tile -> slices & concat are tile-aligned.
        return jnp.concatenate([half(h[:B, :]), half(h[B:, :])], axis=0)

    h1 = jnp.dot(x, w1_ref[...], preferred_element_type=jnp.float32) + b1
    h1 = relu_bn(h1, g1, be1)                                          # [2B, H1]
    h2 = jnp.dot(h1, w2_ref[...], preferred_element_type=jnp.float32) + b2
    h2 = relu_bn(h2, g2, be2)                                          # [2B, H2]
    z = jnp.dot(h2, w3_ref[...], preferred_element_type=jnp.float32) + b3   # [2B, A]

    a = z[:B, :]                   # branch(fp1)
    b = z[B:, :]                   # branch(fp2)
    # cat([a, b], dim=1) @ W4 + b4  ==  a @ W4[:A] + b @ W4[A:] + b4 (exact)
    out_ref[...] = (jnp.dot(a, w4_ref[:A, :], preferred_element_type=jnp.float32)
                    + jnp.dot(b, w4_ref[A:, :], preferred_element_type=jnp.float32)
                    + b4)


def make_params(key, len_embedding, abstract_len_embedding):
    E = len_embedding
    H1 = int(E * 2)
    H2 = int(E * 1.5)
    A = abstract_len_embedding

    def linear(key, fan_in, fan_out):
        # PyTorch-style uniform(-1/sqrt(fan_in), 1/sqrt(fan_in)), deterministic.
        kw, kb = jax.random.split(key)
        bound = 1.0 / np.sqrt(fan_in)
        w = jax.random.uniform(kw, (fan_in, fan_out), jnp.float32, -bound, bound)
        b = jax.random.uniform(kb, (1, fan_out), jnp.float32, -bound, bound)
        return w, b

    k1, k2, k3, k4 = jax.random.split(key, 4)
    w1, b1 = linear(k1, E, H1)
    w2, b2 = linear(k2, H1, H2)
    w3, b3 = linear(k3, H2, A)
    w4, b4 = linear(k4, 2 * A, 1)

    return dict(
        w1=w1, b1=b1, g1=jnp.ones((1, H1), jnp.float32), be1=jnp.zeros((1, H1), jnp.float32),
        w2=w2, b2=b2, g2=jnp.ones((1, H2), jnp.float32), be2=jnp.zeros((1, H2), jnp.float32),
        w3=w3, b3=b3,
        w4=w4, b4=b4,
    )


def pack_params(p):
    """Pack the 8 small per-feature vectors into 3 contiguous arrays."""
    A = p["w3"].shape[1]
    vh1 = jnp.concatenate([p["b1"], p["g1"], p["be1"]], axis=0)        # [3, H1]
    vh2 = jnp.concatenate([p["b2"], p["g2"], p["be2"]], axis=0)        # [3, H2]
    b4_row = jnp.pad(p["b4"], ((0, 0), (0, A - 1)))                    # [1, A]
    vtail = jnp.concatenate([p["b3"], b4_row], axis=0)                 # [2, A]
    return (p["w1"], p["w2"], p["w3"], p["w4"], vh1, vh2, vtail)


def siamese_forward(fp1, fp2, params):
    B = fp1.shape[0]
    args = (fp1, fp2) + pack_params(params)
    vmem = pl.BlockSpec(memory_space=pltpu.MemorySpace.VMEM)
    return pl.pallas_call(
        siamese_kernel,
        out_shape=jax.ShapeDtypeStruct((B, 1), jnp.float32),
        in_specs=[vmem] * len(args),
        out_specs=vmem,
    )(*args)


def siamese_reference(fp1, fp2, p):
    A = p["w3"].shape[1]

    def bn(h, g, b):
        m = jnp.mean(h, axis=0, keepdims=True)
        v = jnp.mean((h - m) ** 2, axis=0, keepdims=True)
        return (h - m) / jnp.sqrt(v + EPS) * g + b

    def branch(x):
        h1 = bn(jnp.maximum(x @ p["w1"] + p["b1"], 0.0), p["g1"], p["be1"])
        h2 = bn(jnp.maximum(h1 @ p["w2"] + p["b2"], 0.0), p["g2"], p["be2"])
        return h2 @ p["w3"] + p["b3"]

    a = branch(fp1)
    b = branch(fp2)
    return a @ p["w4"][:A, :] + b @ p["w4"][A:, :] + p["b4"]


if __name__ == "__main__":
    len_embedding = 32          # E  -> H1 = 64, H2 = 48
    abstract_len_embedding = 8  # A
    batch = 8                   # B (one f32 sublane tile per branch)

    key = jax.random.PRNGKey(0)
    kp, k1, k2 = jax.random.split(key, 3)
    params = make_params(kp, len_embedding, abstract_len_embedding)
    fp1 = jax.random.normal(k1, (batch, len_embedding), jnp.float32)
    fp2 = jax.random.normal(k2, (batch, len_embedding), jnp.float32)

    out = siamese_forward(fp1, fp2, params)
    out = jax.block_until_ready(out)

    ref = siamese_reference(fp1, fp2, params)
    np.testing.assert_allclose(np.asarray(out), np.asarray(ref), rtol=1e-4, atol=1e-4)

    print("KERNEL_OK")
</pallas_src>

<mosaic_0001>
module attributes {stable_mosaic.version = 11 : i64} {
  func.func @siamese_kernel(%arg0: memref<8x32xf32, #tpu.memory_space<vmem>>, %arg1: memref<8x32xf32, #tpu.memory_space<vmem>>, %arg2: memref<32x64xf32, #tpu.memory_space<vmem>>, %arg3: memref<64x48xf32, #tpu.memory_space<vmem>>, %arg4: memref<48x8xf32, #tpu.memory_space<vmem>>, %arg5: memref<16x1xf32, #tpu.memory_space<vmem>>, %arg6: memref<3x64xf32, #tpu.memory_space<vmem>>, %arg7: memref<3x48xf32, #tpu.memory_space<vmem>>, %arg8: memref<2x8xf32, #tpu.memory_space<vmem>>, %arg9: memref<8x1xf32, #tpu.memory_space<vmem>>) attributes {dimension_semantics = [], scalar_prefetch = 0 : i64, scratch_operands = 0 : i64, tpu.core_type = #tpu.core_type<tc>} {
    %c0 = arith.constant 0 : index
    %c0_0 = arith.constant 0 : index
    %0 = vector.load %arg6[%c0, %c0_0] : memref<3x64xf32, #tpu.memory_space<vmem>>, vector<1x64xf32>
    %c1 = arith.constant 1 : index
    %c0_1 = arith.constant 0 : index
    %1 = vector.load %arg6[%c1, %c0_1] : memref<3x64xf32, #tpu.memory_space<vmem>>, vector<1x64xf32>
    %c2 = arith.constant 2 : index
    %c0_2 = arith.constant 0 : index
    %2 = vector.load %arg6[%c2, %c0_2] : memref<3x64xf32, #tpu.memory_space<vmem>>, vector<1x64xf32>
    %c0_3 = arith.constant 0 : index
    %c0_4 = arith.constant 0 : index
    %3 = vector.load %arg7[%c0_3, %c0_4] : memref<3x48xf32, #tpu.memory_space<vmem>>, vector<1x48xf32>
    %c1_5 = arith.constant 1 : index
    %c0_6 = arith.constant 0 : index
    %4 = vector.load %arg7[%c1_5, %c0_6] : memref<3x48xf32, #tpu.memory_space<vmem>>, vector<1x48xf32>
    %c2_7 = arith.constant 2 : index
    %c0_8 = arith.constant 0 : index
    %5 = vector.load %arg7[%c2_7, %c0_8] : memref<3x48xf32, #tpu.memory_space<vmem>>, vector<1x48xf32>
    %c0_9 = arith.constant 0 : index
    %c0_10 = arith.constant 0 : index
    %6 = vector.load %arg8[%c0_9, %c0_10] : memref<2x8xf32, #tpu.memory_space<vmem>>, vector<1x8xf32>
    %c1_11 = arith.constant 1 : index
    %c0_12 = arith.constant 0 : index
    %7 = vector.load %arg8[%c1_11, %c0_12] : memref<2x8xf32, #tpu.memory_space<vmem>>, vector<1x1xf32>
    %c0_13 = arith.constant 0 : index
    %c0_14 = arith.constant 0 : index
    %8 = vector.load %arg0[%c0_13, %c0_14] : memref<8x32xf32, #tpu.memory_space<vmem>>, vector<8x32xf32>
    %c0_15 = arith.constant 0 : index
    %c0_16 = arith.constant 0 : index
    %9 = vector.load %arg1[%c0_15, %c0_16] : memref<8x32xf32, #tpu.memory_space<vmem>>, vector<8x32xf32>
    %10 = tpu.concatenate %8, %9 in 0 : vector<8x32xf32>, vector<8x32xf32> -> vector<16x32xf32>
    %c0_17 = arith.constant 0 : index
    %c0_18 = arith.constant 0 : index
    %11 = vector.load %arg2[%c0_17, %c0_18] : memref<32x64xf32, #tpu.memory_space<vmem>>, vector<32x64xf32>
    %cst = arith.constant dense<0.000000e+00> : vector<16x64xf32>
    %12 = tpu.matmul %10, %11, %cst {dimension_numbers = #tpu.dot_dimension_numbers<[1], [0], [0], [1], [0, 0, 1, 1], [], []>} : vector<16x32xf32>, vector<32x64xf32>, vector<16x64xf32> -> vector<16x64xf32>
    %13 = vector.broadcast %0 : vector<1x64xf32> to vector<16x64xf32>
    %14 = arith.addf %12, %13 : vector<16x64xf32>
    %cst_19 = arith.constant 0.000000e+00 : f32
    %15 = vector.broadcast %cst_19 : f32 to vector<16x64xf32>
    %16 = arith.maximumf %14, %15 : vector<16x64xf32>
    %17 = vector.extract_strided_slice %16 {offsets = [0, 0], sizes = [8, 64], strides = [1, 1]} : vector<16x64xf32> to vector<8x64xf32>
    %cst_20 = arith.constant dense<0.000000e+00> : vector<64xf32>
    %18 = vector.multi_reduction <add>, %17, %cst_20 [0] : vector<8x64xf32> to vector<64xf32>
    %19 = vector.shape_cast %18 : vector<64xf32> to vector<1x64xf32>
    %cst_21 = arith.constant 8.000000e+00 : f32
    %20 = vector.broadcast %cst_21 : f32 to vector<1x64xf32>
    %21 = arith.divf %19, %20 : vector<1x64xf32>
    %22 = arith.mulf %17, %17 : vector<8x64xf32>
    %cst_22 = arith.constant dense<0.000000e+00> : vector<64xf32>
    %23 = vector.multi_reduction <add>, %22, %cst_22 [0] : vector<8x64xf32> to vector<64xf32>
    %24 = vector.shape_cast %23 : vector<64xf32> to vector<1x64xf32>
    %cst_23 = arith.constant 8.000000e+00 : f32
    %25 = vector.broadcast %cst_23 : f32 to vector<1x64xf32>
    %26 = arith.divf %24, %25 : vector<1x64xf32>
    %27 = arith.mulf %21, %21 : vector<1x64xf32>
    %28 = arith.subf %26, %27 : vector<1x64xf32>
    %cst_24 = arith.constant 0.000000e+00 : f32
    %29 = vector.broadcast %cst_24 : f32 to vector<1x64xf32>
    %30 = arith.maximumf %28, %29 : vector<1x64xf32>
    %cst_25 = arith.constant 9.99999974E-6 : f32
    %31 = vector.broadcast %cst_25 : f32 to vector<1x64xf32>
    %32 = arith.addf %30, %31 : vector<1x64xf32>
    %33 = math.rsqrt %32 : vector<1x64xf32>
    %34 = arith.mulf %1, %33 : vector<1x64xf32>
    %35 = arith.mulf %21, %34 : vector<1x64xf32>
    %36 = arith.subf %2, %35 : vector<1x64xf32>
    %37 = vector.broadcast %34 : vector<1x64xf32> to vector<8x64xf32>
    %38 = arith.mulf %17, %37 : vector<8x64xf32>
    %39 = vector.broadcast %36 : vector<1x64xf32> to vector<8x64xf32>
    %40 = arith.addf %38, %39 : vector<8x64xf32>
    %41 = vector.extract_strided_slice %16 {offsets = [8, 0], sizes = [8, 64], strides = [1, 1]} : vector<16x64xf32> to vector<8x64xf32>
    %cst_26 = arith.constant dense<0.000000e+00> : vector<64xf32>
    %42 = vector.multi_reduction <add>, %41, %cst_26 [0] : vector<8x64xf32> to vector<64xf32>
    %43 = vector.shape_cast %42 : vector<64xf32> to vector<1x64xf32>
    %cst_27 = arith.constant 8.000000e+00 : f32
    %44 = vector.broadcast %cst_27 : f32 to vector<1x64xf32>
    %45 = arith.divf %43, %44 : vector<1x64xf32>
    %46 = arith.mulf %41, %41 : vector<8x64xf32>
    %cst_28 = arith.constant dense<0.000000e+00> : vector<64xf32>
    %47 = vector.multi_reduction <add>, %46, %cst_28 [0] : vector<8x64xf32> to vector<64xf32>
    %48 = vector.shape_cast %47 : vector<64xf32> to vector<1x64xf32>
    %cst_29 = arith.constant 8.000000e+00 : f32
    %49 = vector.broadcast %cst_29 : f32 to vector<1x64xf32>
    %50 = arith.divf %48, %49 : vector<1x64xf32>
    %51 = arith.mulf %45, %45 : vector<1x64xf32>
    %52 = arith.subf %50, %51 : vector<1x64xf32>
    %cst_30 = arith.constant 0.000000e+00 : f32
    %53 = vector.broadcast %cst_30 : f32 to vector<1x64xf32>
    %54 = arith.maximumf %52, %53 : vector<1x64xf32>
    %cst_31 = arith.constant 9.99999974E-6 : f32
    %55 = vector.broadcast %cst_31 : f32 to vector<1x64xf32>
    %56 = arith.addf %54, %55 : vector<1x64xf32>
    %57 = math.rsqrt %56 : vector<1x64xf32>
    %58 = arith.mulf %1, %57 : vector<1x64xf32>
    %59 = arith.mulf %45, %58 : vector<1x64xf32>
    %60 = arith.subf %2, %59 : vector<1x64xf32>
    %61 = vector.broadcast %58 : vector<1x64xf32> to vector<8x64xf32>
    %62 = arith.mulf %41, %61 : vector<8x64xf32>
    %63 = vector.broadcast %60 : vector<1x64xf32> to vector<8x64xf32>
    %64 = arith.addf %62, %63 : vector<8x64xf32>
    %65 = tpu.concatenate %40, %64 in 0 : vector<8x64xf32>, vector<8x64xf32> -> vector<16x64xf32>
    %c0_32 = arith.constant 0 : index
    %c0_33 = arith.constant 0 : index
    %66 = vector.load %arg3[%c0_32, %c0_33] : memref<64x48xf32, #tpu.memory_space<vmem>>, vector<64x48xf32>
    %cst_34 = arith.constant dense<0.000000e+00> : vector<16x48xf32>
    %67 = tpu.matmul %65, %66, %cst_34 {dimension_numbers = #tpu.dot_dimension_numbers<[1], [0], [0], [1], [0, 0, 1, 1], [], []>} : vector<16x64xf32>, vector<64x48xf32>, vector<16x48xf32> -> vector<16x48xf32>
    %68 = vector.broadcast %3 : vector<1x48xf32> to vector<16x48xf32>
    %69 = arith.addf %67, %68 : vector<16x48xf32>
    %cst_35 = arith.constant 0.000000e+00 : f32
    %70 = vector.broadcast %cst_35 : f32 to vector<16x48xf32>
    %71 = arith.maximumf %69, %70 : vector<16x48xf32>
    %72 = vector.extract_strided_slice %71 {offsets = [0, 0], sizes = [8, 48], strides = [1, 1]} : vector<16x48xf32> to vector<8x48xf32>
    %cst_36 = arith.constant dense<0.000000e+00> : vector<48xf32>
    %73 = vector.multi_reduction <add>, %72, %cst_36 [0] : vector<8x48xf32> to vector<48xf32>
    %74 = vector.shape_cast %73 : vector<48xf32> to vector<1x48xf32>
    %cst_37 = arith.constant 8.000000e+00 : f32
    %75 = vector.broadcast %cst_37 : f32 to vector<1x48xf32>
    %76 = arith.divf %74, %75 : vector<1x48xf32>
    %77 = arith.mulf %72, %72 : vector<8x48xf32>
    %cst_38 = arith.constant dense<0.000000e+00> : vector<48xf32>
    %78 = vector.multi_reduction <add>, %77, %cst_38 [0] : vector<8x48xf32> to vector<48xf32>
    %79 = vector.shape_cast %78 : vector<48xf32> to vector<1x48xf32>
    %cst_39 = arith.constant 8.000000e+00 : f32
    %80 = vector.broadcast %cst_39 : f32 to vector<1x48xf32>
    %81 = arith.divf %79, %80 : vector<1x48xf32>
    %82 = arith.mulf %76, %76 : vector<1x48xf32>
    %83 = arith.subf %81, %82 : vector<1x48xf32>
    %cst_40 = arith.constant 0.000000e+00 : f32
    %84 = vector.broadcast %cst_40 : f32 to vector<1x48xf32>
    %85 = arith.maximumf %83, %84 : vector<1x48xf32>
    %cst_41 = arith.constant 9.99999974E-6 : f32
    %86 = vector.broadcast %cst_41 : f32 to vector<1x48xf32>
    %87 = arith.addf %85, %86 : vector<1x48xf32>
    %88 = math.rsqrt %87 : vector<1x48xf32>
    %89 = arith.mulf %4, %88 : vector<1x48xf32>
    %90 = arith.mulf %76, %89 : vector<1x48xf32>
    %91 = arith.subf %5, %90 : vector<1x48xf32>
    %92 = vector.broadcast %89 : vector<1x48xf32> to vector<8x48xf32>
    %93 = arith.mulf %72, %92 : vector<8x48xf32>
    %94 = vector.broadcast %91 : vector<1x48xf32> to vector<8x48xf32>
    %95 = arith.addf %93, %94 : vector<8x48xf32>
    %96 = vector.extract_strided_slice %71 {offsets = [8, 0], sizes = [8, 48], strides = [1, 1]} : vector<16x48xf32> to vector<8x48xf32>
    %cst_42 = arith.constant dense<0.000000e+00> : vector<48xf32>
    %97 = vector.multi_reduction <add>, %96, %cst_42 [0] : vector<8x48xf32> to vector<48xf32>
    %98 = vector.shape_cast %97 : vector<48xf32> to vector<1x48xf32>
    %cst_43 = arith.constant 8.000000e+00 : f32
    %99 = vector.broadcast %cst_43 : f32 to vector<1x48xf32>
    %100 = arith.divf %98, %99 : vector<1x48xf32>
    %101 = arith.mulf %96, %96 : vector<8x48xf32>
    %cst_44 = arith.constant dense<0.000000e+00> : vector<48xf32>
    %102 = vector.multi_reduction <add>, %101, %cst_44 [0] : vector<8x48xf32> to vector<48xf32>
    %103 = vector.shape_cast %102 : vector<48xf32> to vector<1x48xf32>
    %cst_45 = arith.constant 8.000000e+00 : f32
    %104 = vector.broadcast %cst_45 : f32 to vector<1x48xf32>
    %105 = arith.divf %103, %104 : vector<1x48xf32>
    %106 = arith.mulf %100, %100 : vector<1x48xf32>
    %107 = arith.subf %105, %106 : vector<1x48xf32>
    %cst_46 = arith.constant 0.000000e+00 : f32
    %108 = vector.broadcast %cst_46 : f32 to vector<1x48xf32>
    %109 = arith.maximumf %107, %108 : vector<1x48xf32>
    %cst_47 = arith.constant 9.99999974E-6 : f32
    %110 = vector.broadcast %cst_47 : f32 to vector<1x48xf32>
    %111 = arith.addf %109, %110 : vector<1x48xf32>
    %112 = math.rsqrt %111 : vector<1x48xf32>
    %113 = arith.mulf %4, %112 : vector<1x48xf32>
    %114 = arith.mulf %100, %113 : vector<1x48xf32>
    %115 = arith.subf %5, %114 : vector<1x48xf32>
    %116 = vector.broadcast %113 : vector<1x48xf32> to vector<8x48xf32>
    %117 = arith.mulf %96, %116 : vector<8x48xf32>
    %118 = vector.broadcast %115 : vector<1x48xf32> to vector<8x48xf32>
    %119 = arith.addf %117, %118 : vector<8x48xf32>
    %120 = tpu.concatenate %95, %119 in 0 : vector<8x48xf32>, vector<8x48xf32> -> vector<16x48xf32>
    %c0_48 = arith.constant 0 : index
    %c0_49 = arith.constant 0 : index
    %121 = vector.load %arg4[%c0_48, %c0_49] : memref<48x8xf32, #tpu.memory_space<vmem>>, vector<48x8xf32>
    %cst_50 = arith.constant dense<0.000000e+00> : vector<16x8xf32>
    %122 = tpu.matmul %120, %121, %cst_50 {dimension_numbers = #tpu.dot_dimension_numbers<[1], [0], [0], [1], [0, 0, 1, 1], [], []>} : vector<16x48xf32>, vector<48x8xf32>, vector<16x8xf32> -> vector<16x8xf32>
    %123 = vector.broadcast %6 : vector<1x8xf32> to vector<16x8xf32>
    %124 = arith.addf %122, %123 : vector<16x8xf32>
    %125 = vector.extract_strided_slice %124 {offsets = [0, 0], sizes = [8, 8], strides = [1, 1]} : vector<16x8xf32> to vector<8x8xf32>
    %126 = vector.extract_strided_slice %124 {offsets = [8, 0], sizes = [8, 8], strides = [1, 1]} : vector<16x8xf32> to vector<8x8xf32>
    %c0_51 = arith.constant 0 : index
    %c0_52 = arith.constant 0 : index
    %127 = vector.load %arg5[%c0_51, %c0_52] : memref<16x1xf32, #tpu.memory_space<vmem>>, vector<8x1xf32>
    %cst_53 = arith.constant dense<0.000000e+00> : vector<8x1xf32>
    %128 = tpu.matmul %125, %127, %cst_53 {dimension_numbers = #tpu.dot_dimension_numbers<[1], [0], [0], [1], [0, 0, 1, 1], [], []>} : vector<8x8xf32>, vector<8x1xf32>, vector<8x1xf32> -> vector<8x1xf32>
    %c8 = arith.constant 8 : index
    %c0_54 = arith.constant 0 : index
    %129 = vector.load %arg5[%c8, %c0_54] : memref<16x1xf32, #tpu.memory_space<vmem>>, vector<8x1xf32>
    %cst_55 = arith.constant dense<0.000000e+00> : vector<8x1xf32>
    %130 = tpu.matmul %126, %129, %cst_55 {dimension_numbers = #tpu.dot_dimension_numbers<[1], [0], [0], [1], [0, 0, 1, 1], [], []>} : vector<8x8xf32>, vector<8x1xf32>, vector<8x1xf32> -> vector<8x1xf32>
    %131 = arith.addf %128, %130 : vector<8x1xf32>
    %132 = vector.broadcast %7 : vector<1x1xf32> to vector<8x1xf32>
    %133 = arith.addf %131, %132 : vector<8x1xf32>
    %c0_56 = arith.constant 0 : index
    %c0_57 = arith.constant 0 : index
    %134 = vector.load %arg9[%c0_56, %c0_57] : memref<8x1xf32, #tpu.memory_space<vmem>>, vector<8x1xf32>
    tpu.vector_store %arg9[%c0_56, %c0_57], %133 {strides = array<i32>} : memref<8x1xf32, #tpu.memory_space<vmem>>, vector<8x1xf32>,
    return
  }
}

</mosaic_0001>

<bundles_post_ra>
// kernel: tpu_custom_call.1
= control target key start
LH: loop header
LB: loop body
LE: loop exit
PB: predicated region body
PF: predicated region fallthrough
CT: control target
= control target key end

     0   :  { %vm47_vm0 = vcmask 261120   ;;  %v396_v6 = vmov 8.0   ;;  %vm79_vm1 = vcmask 523264   ;;  %vm203_vm9 = vcmask 392192   ;;  %s586_s2 = inlined_call_operand.vmem [shape: f32[32,64], index: 2, kind: input, shape index: {}]   ;;  %s587_s6 = inlined_call_operand.vmem [shape: f32[3,64], index: 6, kind: input, shape index: {}]   ;;  %s588_s0 = inlined_call_operand.vmem [shape: f32[8,32], index: 0, kind: input, shape index: {}]   ;;  %s589_s1 = inlined_call_operand.vmem [shape: f32[8,32], index: 1, kind: input, shape index: {}]   ;;  %s590_s7 = inlined_call_operand.vmem [shape: f32[3,48], index: 7, kind: input, shape index: {}]   ;;  %s591_s3 = inlined_call_operand.vmem [shape: f32[64,48], index: 3, kind: input, shape index: {}]   ;;  %s592_s8 = inlined_call_operand.vmem [shape: f32[2,8], index: 8, kind: input, shape index: {}]   ;;  %s593_s4 = inlined_call_operand.vmem [shape: f32[48,8], index: 4, kind: input, shape index: {}]   ;;  %s594_s5 = inlined_call_operand.vmem [shape: f32[16,1], index: 5, kind: input, shape index: {}]   ;;  %s595_s9 = inlined_call_operand.vmem [shape: f32[8,1], index: 9, kind: output, shape index: {}]  }
   0x1   :  { %v45_v0 = vld [vmem:[%s586_s2 + $0x18] sm:$0xff]  ;;  %v44_v1 = vld [vmem:[%s586_s2 + $0x10] sm:$0xff]  ;;  %v43_v2 = vld [vmem:[%s586_s2 + $0x8] sm:$0xff]  ;;  %386 = vrcp.f32 %v396_v6 }
   0x2   :  { %66 = vmatpush.msra.mxu0 %v45_v0  ;;  %v42_v3 = vld [vmem:[%s586_s2] sm:$0xff]  ;;  %v170_v22 = vld [vmem:[%s591_s3 + $0x38] sm:$0xff]  ;;  %v169_v26 = vld [vmem:[%s591_s3 + $0x30] sm:$0xff] }
   0x3   :  { %v40_v4 = vld [vmem:[%s588_s0] sm:$0xff]  ;;  %186 = vmatpush.msra.mxu1 %v170_v22  ;;  %v168_v31 = vld [vmem:[%s591_s3 + $0x28] sm:$0xff]  ;;  %v166_v44 = vld [vmem:[%s591_s3 + $0x18] sm:$0xff] }
   0x4   :  { %67 = vmatpush.msra.mxu0 %v44_v1  ;;  %v41_v5 = vld [vmem:[%s589_s1] sm:$0xff]  ;;  %v165_v49 = vld [vmem:[%s591_s3 + $0x10] sm:$0xff]  ;;  %v164_v54 = vld [vmem:[%s591_s3 + $0x8] sm:$0xff] }
   0x5   :  { %v382_v8 = vld [vmem:[%s587_s6] ss:$0 sm:$0xff]  ;;  %187 = vmatpush.msra.mxu1 %v169_v26 }
   0x6   :  { %68 = vmatpush.msra.mxu0 %v43_v2  ;;  %v167_v37 = vld [vmem:[%s591_s3 + $0x20] sm:$0xff] }
   0x7   :  { %v387_v7 = vpop.eup %386  ;;  %188 = vmatpush.msra.mxu1 %v168_v31  ;;  %v163_v58 = vld [vmem:[%s591_s3] sm:$0xff] }
   0x8   :  { %69 = vmatpush.msra.mxu0 %v42_v3  ;;  %v88_v9 = vmul.f32 8.0, %v387_v7  ;;  %vm92_vm2 = vweird.f32 %v387_v7 }
   0x9   :  { %373 = vmatmul.msk.f32.vlgmr.msra.gmra.mxu0 %vm47_vm0, %v40_v4  ;;  %189 = vmatpush.msra.mxu1 %v167_v37 }
   0xa   :  { %v89_v13 = vsub.f32 1.0, %v88_v9 }
   0xb   :  { %190 = vmatpush.msra.mxu1 %v166_v44 }
   0xc   :  { %v90_v17 = vmul.f32 %v387_v7, %v89_v13  ;;  %v33_v13 = vld [vmem:[%s587_s6 + $0x1] sm:$0x1] }
   0xd   :  { %191 = vmatpush.msra.mxu1 %v165_v49 }
   0xe   :  { %v91_v27 = vadd.f32 %v387_v7, %v90_v17 }
   0xf   :  { %192 = vmatpush.msra.mxu1 %v164_v54  ;;  %v285_v54 = vld [vmem:[%s593_s4 + $0x28] sm:$0xff] }
  0x10   :  { %v493_v38 = vsel %vm92_vm2, %v387_v7, %v91_v27  ;;  %303 = vmatpush.msra.mxu2 %v285_v54 }
  0x11   :  { %374 = vmatmul.msk.f32.gmra.mxu0 %vm47_vm0, %v41_v5  ;;  %193 = vmatpush.msra.mxu1 %v163_v58  ;;  %vm318_vm0 = vcmask 64512  }
  0x86   :  { %v71_v10 = vpop.f32.mrf.mxu0 }
  0x87   :  { %v72_v11 = vadd.f32 %v382_v8, %v71_v10 }
  0x89   :  { %v468_v12 = vmax.f32 %v72_v11, 0.0 }
  0x8b   :  { %v80_v14 = vsel %vm79_vm1, %v468_v12, 0.0  ;;  %v95_v15 = vmul.f32 %v468_v12, %v468_v12 }
  0x8c   :  { %v81_v16 = vrot.slane %v80_v14, 4 }
  0x8d   :  { %v96_v18 = vsel %vm79_vm1, %v95_v15, 0.0 }
  0x8e   :  { %v82_v19 = vadd.f32 %v81_v16, %v80_v14  ;;  %v97_v20 = vrot.slane %v96_v18, 4  ;;  %v74_v21 = vpop.f32.mrf.mxu0 }
  0x8f   :  { %v75_v23 = vadd.f32 %v382_v8, %v74_v21 }
  0x90   :  { %v83_v24 = vrot.slane %v82_v19, 2  ;;  %v98_v25 = vadd.f32 %v97_v20, %v96_v18 }
  0x91   :  { %v481_v28 = vmax.f32 %v75_v23, 0.0 }
  0x92   :  { %v84_v29 = vadd.f32 %v83_v24, %v82_v19  ;;  %v99_v30 = vrot.slane %v98_v25, 2  ;;  %v34_v19 = vld [vmem:[%s587_s6 + $0x2] sm:$0x1] }
  0x93   :  { %v125_v32 = vsel %vm79_vm1, %v481_v28, 0.0  ;;  %v133_v33 = vmul.f32 %v481_v28, %v481_v28 }
  0x94   :  { %v85_v34 = vrot.slane %v84_v29, 1  ;;  %v100_v35 = vadd.f32 %v99_v30, %v98_v25  ;;  %v126_v36 = vrot.slane %v125_v32, 4 }
  0x95   :  { %v134_v39 = vsel %vm79_vm1, %v133_v33, 0.0 }
  0x96   :  { %v86_v40 = vadd.f32 %v85_v34, %v84_v29  ;;  %v101_v41 = vrot.slane %v100_v35, 1  ;;  %v127_v42 = vadd.f32 %v126_v36, %v125_v32  ;;  %v135_v43 = vrot.slane %v134_v39, 4 }
  0x98   :  { %v94_v45 = vmul.f32 %v493_v38, %v86_v40  ;;  %v102_v46 = vadd.f32 %v101_v41, %v100_v35  ;;  %v128_v47 = vrot.slane %v127_v42, 2  ;;  %v136_v48 = vadd.f32 %v135_v43, %v134_v39 }
  0x9a   :  { %v103_v50 = vmul.f32 %v102_v46, %v493_v38  ;;  %v104_v51 = vmul.f32 %v94_v45, %v94_v45  ;;  %v129_v52 = vadd.f32 %v128_v47, %v127_v42  ;;  %v137_v53 = vrot.slane %v136_v48, 2 }
  0x9c   :  { %v105_v55 = vsub.f32 %v103_v50, %v104_v51  ;;  %v130_v56 = vrot.slane %v129_v52, 1  ;;  %v138_v57 = vadd.f32 %v137_v53, %v136_v48 }
  0x9e   :  { %v106_v59 = vmax.f32 %v105_v55, 0.0  ;;  %v131_v60 = vadd.f32 %v130_v56, %v129_v52  ;;  %v139_v61 = vrot.slane %v138_v57, 1 }
  0xa0   :  { %v107_v62 = vadd.f32 1e-05, %v106_v59  ;;  %v132_v63 = vmul.f32 %v131_v60, %v493_v38  ;;  %v140_v0 = vadd.f32 %v139_v61, %v138_v57  ;;  %v284_v60 = vld [vmem:[%s593_s4 + $0x20] sm:$0xff] }
  0xa1   :  { %304 = vmatpush.msra.mxu2 %v284_v60  ;;  %v316_v60 = vld [vmem:[%s594_s5] sm:$0xff] }
  0xa2   :  { %388 = vrsqrt.f32 %v107_v62  ;;  %v141_v1 = vmul.f32 %v140_v0, %v493_v38  ;;  %v142_v2 = vmul.f32 %v132_v63, %v132_v63  ;;  %vm114_vm4 = vweird.f32 %v107_v62 }
  0xa4   :  { %v143_v3 = vsub.f32 %v141_v1, %v142_v2  ;;  %v283_v2 = vld [vmem:[%s593_s4 + $0x18] sm:$0xff] }
  0xa5   :  { %305 = vmatpush.msra.mxu2 %v283_v2  ;;  %v385_v2 = vld [vmem:[%s592_s8 + $0x1] ss:$0 sm:$0xff] }
  0xa6   :  { %v144_v4 = vmax.f32 %v143_v3, 0.0 }
  0xa8   :  { %v389_v5 = vpop.eup %388  ;;  %v145_v6 = vadd.f32 1e-05, %v144_v4 }
  0xa9   :  { %v109_v7 = vmul.f32 %v389_v5, %v107_v62  ;;  %vm115_vm3 = vweird.f32 %v389_v5 }
  0xaa   :  { %390 = vrsqrt.f32 %v145_v6  ;;  %vm116_vm5 = vmor %vm114_vm4, %vm115_vm3  ;;  %vm152_vm7 = vweird.f32 %v145_v6 }
  0xab   :  { %v110_v8 = vmul.f32 %v389_v5, %v109_v7  ;;  %v282_v7 = vld [vmem:[%s593_s4 + $0x10] sm:$0xff] }
  0xac   :  { %306 = vmatpush.msra.mxu2 %v282_v7 }
  0xad   :  { %v111_v9 = vmul.f32 0.5, %v110_v8 }
  0xaf   :  { %v112_v10 = vsub.f32 1.5, %v111_v9 }
  0xb0   :  { %v391_v11 = vpop.eup %390 }
  0xb1   :  { %v113_v14 = vmul.f32 %v389_v5, %v112_v10  ;;  %v147_v15 = vmul.f32 %v391_v11, %v145_v6  ;;  %vm153_vm6 = vweird.f32 %v391_v11 }
  0xb2   :  { %vm154_vm8 = vmor %vm152_vm7, %vm153_vm6 }
  0xb3   :  { %v117_v16 = vsel %vm116_vm5, %v389_v5, %v113_v14  ;;  %v148_v17 = vmul.f32 %v391_v11, %v147_v15 }
  0xb4   :  { %v118_v18 = vmul.f32 %v117_v16, %v33_v13 }
  0xb5   :  { %v149_v20 = vmul.f32 0.5, %v148_v17  ;;  %v280_v17 = vld [vmem:[%s593_s4] sm:$0xff] }
  0xb6   :  { %v121_v21 = vperm.slane %v118_v18, 0  ;;  %v119_v22 = vmul.f32 %v118_v18, %v94_v45 }
  0xb7   :  { %v150_v23 = vsub.f32 1.5, %v149_v20 }
  0xb8   :  { %v120_v24 = vsub.f32 %v34_v19, %v119_v22  ;;  %v122_v26 = vmul.f32 %v121_v21, %v468_v12  ;;  %v383_v12 = vld [vmem:[%s590_s7] ss:$0 sm:$0xff] }
  0xb9   :  { %v151_v25 = vmul.f32 %v391_v11, %v150_v23 }
  0xba   :  { %v123_v27 = vperm.slane %v120_v24, 0 }
  0xbb   :  { %v155_v29 = vsel %vm154_vm8, %v391_v11, %v151_v25 }
  0xbc   :  { %v156_v30 = vmul.f32 %v155_v29, %v33_v13  ;;  %v124_v31 = vadd.f32 %v123_v27, %v122_v26  ;;  %v281_v13 = vld [vmem:[%s593_s4 + $0x8] sm:$0xff] }
  0xbd   :  { %307 = vmatpush.msra.mxu2 %v281_v13 }
  0xbe   :  { %v159_v32 = vperm.slane %v156_v30, 0  ;;  %375 = vmatmul.msk.f32.vlgmr.msra.gmra.mxu1 %vm79_vm1, %v124_v31  ;;  %v157_v33 = vmul.f32 %v156_v30, %v132_v63 }
  0xbf   :  { %308 = vmatpush.msra.mxu2 %v280_v17 }
  0xc0   :  { %v158_v34 = vsub.f32 %v34_v19, %v157_v33  ;;  %v160_v35 = vmul.f32 %v159_v32, %v481_v28 }
  0xc2   :  { %v161_v36 = vperm.slane %v158_v34, 0 }
  0xc4   :  { %v162_v37 = vadd.f32 %v161_v36, %v160_v35  ;;  %v36_v36 = vld [vmem:[%s590_s7 + $0x1] sm:$0x1] }
  0xc6   :  { %376 = vmatmul.msk.f32.gmra.mxu1 %vm79_vm1, %v162_v37  ;;  %vm367_vm1 = vcmask 7168  }
 0x13b   :  { %v195_v39 = vpop.f32.mrf.mxu1 }
 0x13c   :  { %v196_v40 = vadd.f32 %v383_v12, %v195_v39 }
 0x13e   :  { %v525_v41 = vmax.f32 %v196_v40, 0.0 }
 0x140   :  { %v204_v42 = vsel %vm203_vm9, %v525_v41, 0.0  ;;  %v212_v43 = vmul.f32 %v525_v41, %v525_v41 }
 0x141   :  { %v205_v28 = vrot.slane %v204_v42, 4 }
 0x142   :  { %v213_v44 = vsel %vm203_vm9, %v212_v43, 0.0 }
 0x143   :  { %v206_v45 = vadd.f32 %v205_v28, %v204_v42  ;;  %v214_v46 = vrot.slane %v213_v44, 4  ;;  %v198_v47 = vpop.f32.mrf.mxu1  ;;  %v37_v42 = vld [vmem:[%s590_s7 + $0x2] sm:$0x1] }
 0x144   :  { %v199_v48 = vadd.f32 %v383_v12, %v198_v47 }
 0x145   :  { %v207_v49 = vrot.slane %v206_v45, 2  ;;  %v215_v50 = vadd.f32 %v214_v46, %v213_v44 }
 0x146   :  { %v532_v51 = vmax.f32 %v199_v48, 0.0 }
 0x147   :  { %v208_v52 = vadd.f32 %v207_v49, %v206_v45  ;;  %v216_v53 = vrot.slane %v215_v50, 2 }
 0x148   :  { %v242_v55 = vsel %vm203_vm9, %v532_v51, 0.0  ;;  %v250_v56 = vmul.f32 %v532_v51, %v532_v51 }
 0x149   :  { %v209_v57 = vrot.slane %v208_v52, 1  ;;  %v217_v58 = vadd.f32 %v216_v53, %v215_v50  ;;  %v243_v59 = vrot.slane %v242_v55, 4 }
 0x14a   :  { %v251_v61 = vsel %vm203_vm9, %v250_v56, 0.0 }
 0x14b   :  { %v210_v62 = vadd.f32 %v209_v57, %v208_v52  ;;  %v218_v63 = vrot.slane %v217_v58, 1  ;;  %v244_v0 = vadd.f32 %v243_v59, %v242_v55  ;;  %v252_v1 = vrot.slane %v251_v61, 4 }
 0x14d   :  { %v211_v3 = vmul.f32 %v210_v62, %v493_v38  ;;  %v219_v4 = vadd.f32 %v218_v63, %v217_v58  ;;  %v245_v5 = vrot.slane %v244_v0, 2  ;;  %v253_v6 = vadd.f32 %v252_v1, %v251_v61  ;;  %v384_v62 = vld [vmem:[%s592_s8] ss:$0 sm:$0xff] }
 0x14f   :  { %v220_v8 = vmul.f32 %v219_v4, %v493_v38  ;;  %v221_v9 = vmul.f32 %v211_v3, %v211_v3  ;;  %v246_v10 = vadd.f32 %v245_v5, %v244_v0  ;;  %v254_v11 = vrot.slane %v253_v6, 2 }
 0x151   :  { %v222_v14 = vsub.f32 %v220_v8, %v221_v9  ;;  %v247_v15 = vrot.slane %v246_v10, 1  ;;  %v255_v16 = vadd.f32 %v254_v11, %v253_v6 }
 0x153   :  { %v223_v18 = vmax.f32 %v222_v14, 0.0  ;;  %v248_v19 = vadd.f32 %v247_v15, %v246_v10  ;;  %v256_v20 = vrot.slane %v255_v16, 1 }
 0x155   :  { %v224_v21 = vadd.f32 1e-05, %v223_v18  ;;  %v249_v22 = vmul.f32 %v248_v19, %v493_v38  ;;  %v257_v23 = vadd.f32 %v256_v20, %v255_v16 }
 0x157   :  { %392 = vrsqrt.f32 %v224_v21  ;;  %v258_v24 = vmul.f32 %v257_v23, %v493_v38  ;;  %v259_v25 = vmul.f32 %v249_v22, %v249_v22  ;;  %vm231_vm11 = vweird.f32 %v224_v21 }
 0x159   :  { %v260_v26 = vsub.f32 %v258_v24, %v259_v25 }
 0x15b   :  { %v261_v27 = vmax.f32 %v260_v26, 0.0 }
 0x15d   :  { %v393_v29 = vpop.eup %392  ;;  %v262_v30 = vadd.f32 1e-05, %v261_v27 }
 0x15e   :  { %v226_v31 = vmul.f32 %v393_v29, %v224_v21  ;;  %vm232_vm10 = vweird.f32 %v393_v29 }
 0x15f   :  { %394 = vrsqrt.f32 %v262_v30  ;;  %vm233_vm12 = vmor %vm231_vm11, %vm232_vm10  ;;  %vm269_vm14 = vweird.f32 %v262_v30 }
 0x160   :  { %v227_v32 = vmul.f32 %v393_v29, %v226_v31 }
 0x162   :  { %v228_v33 = vmul.f32 0.5, %v227_v32 }
 0x164   :  { %v229_v34 = vsub.f32 1.5, %v228_v33 }
 0x165   :  { %v395_v35 = vpop.eup %394 }
 0x166   :  { %v230_v37 = vmul.f32 %v393_v29, %v229_v34  ;;  %v264_v12 = vmul.f32 %v395_v35, %v262_v30  ;;  %vm270_vm13 = vweird.f32 %v395_v35 }
 0x167   :  { %vm271_vm15 = vmor %vm269_vm14, %vm270_vm13 }
 0x168   :  { %v234_v38 = vsel %vm233_vm12, %v393_v29, %v230_v37  ;;  %v265_v39 = vmul.f32 %v395_v35, %v264_v12 }
 0x169   :  { %v235_v40 = vmul.f32 %v234_v38, %v36_v36 }
 0x16a   :  { %v266_v43 = vmul.f32 0.5, %v265_v39 }
 0x16b   :  { %v238_v28 = vperm.slane %v235_v40, 0  ;;  %v236_v44 = vmul.f32 %v235_v40, %v211_v3 }
 0x16c   :  { %v267_v45 = vsub.f32 1.5, %v266_v43 }
 0x16d   :  { %v237_v46 = vsub.f32 %v37_v42, %v236_v44  ;;  %v239_v48 = vmul.f32 %v238_v28, %v525_v41  ;;  %v317_v41 = vld [vmem:[%s594_s5 + $0x8] sm:$0xff] }
 0x16e   :  { %v268_v47 = vmul.f32 %v395_v35, %v267_v45  ;;  %337 = vmatpush.msra.mxu3 %v317_v41 }
 0x16f   :  { %v240_v49 = vperm.slane %v237_v46, 0 }
 0x170   :  { %v272_v50 = vsel %vm271_vm15, %v395_v35, %v268_v47  ;;  %360 = vmatpush.msrb.mxu3 %v316_v60 }
 0x171   :  { %v273_v52 = vmul.f32 %v272_v50, %v36_v36  ;;  %v241_v53 = vadd.f32 %v240_v49, %v239_v48 }
 0x173   :  { %v276_v54 = vperm.slane %v273_v52, 0  ;;  %377 = vmatmul.msk.f32.vlgmr.msra.gmra.mxu2 %vm203_vm9, %v241_v53  ;;  %v274_v55 = vmul.f32 %v273_v52, %v249_v22 }
 0x175   :  { %v275_v56 = vsub.f32 %v37_v42, %v274_v55  ;;  %v277_v57 = vmul.f32 %v276_v54, %v532_v51 }
 0x177   :  { %v278_v58 = vperm.slane %v275_v56, 0 }
 0x179   :  { %v279_v59 = vadd.f32 %v278_v58, %v277_v57 }
 0x17b   :  { %378 = vmatmul.msk.f32.gmra.mxu2 %vm203_vm9, %v279_v59 }
 0x1f6   :  { %v310_v61 = vpop.f32.mrf.mxu2 }
 0x1f7   :  { %v311_v0 = vadd.f32 %v384_v62, %v310_v61 }
 0x1fe   :  { %v313_v51 = vpop.f32.mrf.mxu2 }
 0x1ff   :  { %v314_v63 = vadd.f32 %v384_v62, %v313_v51 }
 0x201   :  { %379 = vmatmul.msk.f32.vlgmr.msra.gmra.mxu3 %vm318_vm0, %v314_v63 }
 0x209   :  { %380 = vmatmul.msk.f32.vlgmr.msrb.gmra.mxu3 %vm318_vm0, %v311_v0 }
 0x284   :  { %v339_v1 = vpop.f32.mrf.mxu3 }
 0x28c   :  { %v362_v3 = vpop.f32.mrf.mxu3 }
 0x28d   :  { %v363_v4 = vadd.f32 %v362_v3, %v339_v1 }
 0x28f   :  { %v366_v5 = vadd.f32 %v385_v2, %v363_v4 }
 0x291   :  { %368 = vst.msk [vmem:[%s595_s9] sm:$0xff] %vm367_vm1, %v366_v5 }

</bundles_post_ra>
